<compile_context>
chip_gen: v7x
topology: tpu7x:2x2x1
jax: 0.10.0
libtpu: 0.0.40
codegen_flags: <defaults>
</compile_context>

<pallas_src>
import functools

import jax
import jax.numpy as jnp
from jax.experimental import pallas as pl
from jax.experimental.pallas import tpu as pltpu


def _series_decomp_kernel(x_ref, res_ref, mean_ref, *, kernel_size, pad,
                          front_total, end_total):
    # x_ref: (1, L, TILE_C) block of the input; outputs share the block shape.
    x = x_ref[0]                                    # (L, TILE_C)
    L, tc = x.shape
    x32 = x.astype(jnp.float32)

    # Edge-replicated, sublane-aligned padded series built in VMEM/vregs:
    #   [front_total rows of x[0]] [x] [end_total rows of x[L-1]]
    # front_total = round_up(pad, 8) so the x piece sits at an aligned sublane
    # offset; end_total pads the total length n to a multiple of 8.
    pieces = []
    if front_total > 0:
        pieces.append(jnp.broadcast_to(x32[0:1, :], (front_total, tc)))
    pieces.append(x32)
    if end_total > 0:
        pieces.append(jnp.broadcast_to(x32[L - 1:L, :], (end_total, tc)))
    xp = pieces[0] if len(pieces) == 1 else jnp.concatenate(pieces, axis=0)
    n = xp.shape[0]                                 # n % 8 == 0

    # Centered window sum of width K via log-doubling:
    #   acc[i] = sum_{d=-pad..pad} xp[i + d]   for the rows read back.
    # Forward partial windows W_w[i] = sum_{j<w} xp[i+j] are doubled with one
    # rotate each (W_{2w}[i] = W_w[i] + W_w[i+w]); each set bit of K is placed
    # at its offset with one more rotate.  For every row i in
    # [front_total, front_total+L) all indices touched stay inside [0, n), so
    # rotation wrap-around never contaminates the rows that are read back.
    acc = None
    w = xp                                          # width-1 window sum
    width = 1
    off = 0                                         # window rows already placed
    k = kernel_size
    while k:
        if k & 1:
            s = (pad - off) % n                     # result[i] = W_width[i - pad + off]
            part = w if s == 0 else pltpu.roll(w, s, axis=0)
            acc = part if acc is None else acc + part
            off += width
        k >>= 1
        if k:
            w = w + pltpu.roll(w, n - width, axis=0)   # W_{2w}[i] = W_w[i] + W_w[i+w]
            width *= 2

    mean = acc[front_total:front_total + L, :] * jnp.float32(1.0 / kernel_size)
    mean_ref[0] = mean.astype(mean_ref.dtype)
    # Residual from the already-cast series (no second cast pass over x).
    res_ref[0] = (x32 - mean).astype(res_ref.dtype)


def _chip_budgets():
    """(scoped vmem limit, per-block budget, channel-tile cap) per generation."""
    vmem_phys = 128 * 1024 * 1024
    try:
        info = pltpu.get_tpu_info()
        vmem_phys = int(getattr(info, "vmem_capacity_bytes", vmem_phys) or vmem_phys)
    except Exception:
        pass
    if vmem_phys <= 64 * 1024 * 1024:
        # v7x-class: 64 MiB physical per TensorCore.
        return 40 * 1024 * 1024, 14 * 1024 * 1024, 512
    # v5e / v6e: 128 MiB physical.
    return 64 * 1024 * 1024, 24 * 1024 * 1024, 1024


def _pick_tile_c(B, L, n, C, itemsize, budget, cap):
    """Channel tile that keeps the per-block working set inside `budget`."""
    # 2x double-buffered input + 2x2 double-buffered outputs + f32 mean/res
    # temporaries (L rows) + padded series / partial-window / acc / rotate
    # temporaries (n rows, f32, conservative 4 copies).
    per_col = L * (6 * itemsize + 2 * 4) + n * 4 * 4
    max_cols = max(int(budget // max(per_col, 1)), 8)

    if C <= 128 or (C % 128 != 0 and C <= max_cols and C <= cap):
        tile_c = C                                   # full-dim block ((8,128) rule)
    else:
        tile_c = min(cap, max(128, (min(max_cols, C) // 128) * 128))

    # v7x megacore parity: give both TensorCores work when the grid would
    # otherwise be a single step.
    if B == 1 and tile_c == C and C % 256 == 0:
        tile_c = C // 2
    return tile_c


def series_decomp(x, kernel_size):
    """x: (B, L, C) -> (res, moving_mean); matches the PyTorch series_decomp."""
    if kernel_size % 2 != 1:
        raise ValueError(
            "series_decomp requires an odd kernel_size: with stride=1 the PyTorch "
            "module's `x - moving_mean` only type-checks when L_out == L.")
    B, L, C = x.shape
    pad = (kernel_size - 1) // 2
    front_total = -(-pad // 8) * 8                       # round_up(pad, 8)
    end_total = pad + ((-(front_total + L + pad)) % 8)   # n becomes a multiple of 8
    n = front_total + L + end_total

    itemsize = jnp.dtype(x.dtype).itemsize
    vmem_limit, budget, cap = _chip_budgets()
    tile_c = _pick_tile_c(B, L, n, C, itemsize, budget, cap)
    grid = (B, pl.cdiv(C, tile_c))

    kernel = functools.partial(
        _series_decomp_kernel, kernel_size=kernel_size, pad=pad,
        front_total=front_total, end_total=end_total)

    blk = pl.BlockSpec((1, L, tile_c), lambda b, c: (b, 0, c))

    res, mean = pl.pallas_call(
        kernel,
        out_shape=(jax.ShapeDtypeStruct((B, L, C), x.dtype),
                   jax.ShapeDtypeStruct((B, L, C), x.dtype)),
        grid_spec=pltpu.PrefetchScalarGridSpec(
            num_scalar_prefetch=0,
            grid=grid,
            in_specs=[blk],
            out_specs=(blk, blk),
        ),
        compiler_params=pltpu.CompilerParams(
            dimension_semantics=("parallel", "parallel"),
            vmem_limit_bytes=vmem_limit,
        ),
    )(x)
    return res, mean


def _series_decomp_ref(x, kernel_size):
    """Pure-JAX reference mirroring the PyTorch series_decomp."""
    pad = (kernel_size - 1) // 2
    front = jnp.repeat(x[:, :1, :], pad, axis=1)
    end = jnp.repeat(x[:, -1:, :], pad, axis=1)
    xp = jnp.concatenate([front, x, end], axis=1)
    mean = jnp.stack(
        [jnp.mean(xp[:, t:t + kernel_size, :], axis=1) for t in range(x.shape[1])],
        axis=1)
    return x - mean, mean


if __name__ == "__main__":
    key = jax.random.PRNGKey(0)
    B, L, C = 2, 16, 8
    kernel_size = 5

    x = jax.random.normal(key, (B, L, C), dtype=jnp.float32)

    res, mean = series_decomp(x, kernel_size)
    res = jax.block_until_ready(res)
    mean = jax.block_until_ready(mean)

    res_ref, mean_ref = _series_decomp_ref(x, kernel_size)
    assert mean.shape == mean_ref.shape, (mean.shape, mean_ref.shape)
    assert res.shape == res_ref.shape, (res.shape, res_ref.shape)
    assert jnp.allclose(mean, mean_ref, atol=1e-5, rtol=1e-5), "moving_mean mismatch"
    assert jnp.allclose(res, res_ref, atol=1e-5, rtol=1e-5), "residual mismatch"

    print("KERNEL_OK")
</pallas_src>

<mosaic_0001>
module attributes {stable_mosaic.version = 11 : i64} {
  func.func @_series_decomp_kernel(%arg0: i32, %arg1: i32, %arg2: memref<1x16x8xf32, #tpu.memory_space<vmem>>, %arg3: memref<1x16x8xf32, #tpu.memory_space<vmem>>, %arg4: memref<1x16x8xf32, #tpu.memory_space<vmem>>) attributes {dimension_semantics = [#tpu.dimension_semantics<parallel>, #tpu.dimension_semantics<parallel>], iteration_bounds = array<i64: 2, 1>, scalar_prefetch = 0 : i64, scratch_operands = 0 : i64, tpu.core_type = #tpu.core_type<tc>, window_params = [{transform_indices = @transform_0, window_bounds = array<i64: 1, 16, 8>}, {transform_indices = @transform_1, window_bounds = array<i64: 1, 16, 8>}, {transform_indices = @transform_2, window_bounds = array<i64: 1, 16, 8>}]} {
    %c0 = arith.constant 0 : index
    %c0_0 = arith.constant 0 : index
    %c0_1 = arith.constant 0 : index
    %0 = vector.load %arg2[%c0, %c0_0, %c0_1] : memref<1x16x8xf32, #tpu.memory_space<vmem>>, vector<1x16x8xf32>
    %1 = vector.shape_cast %0 : vector<1x16x8xf32> to vector<16x8xf32>
    %2 = vector.extract_strided_slice %1 {offsets = [0, 0], sizes = [1, 8], strides = [1, 1]} : vector<16x8xf32> to vector<1x8xf32>
    %3 = vector.shape_cast %2 : vector<1x8xf32> to vector<1x8xf32>
    %4 = vector.broadcast %3 : vector<1x8xf32> to vector<8x8xf32>
    %5 = vector.extract_strided_slice %1 {offsets = [15, 0], sizes = [1, 8], strides = [1, 1]} : vector<16x8xf32> to vector<1x8xf32>
    %6 = vector.shape_cast %5 : vector<1x8xf32> to vector<1x8xf32>
    %7 = vector.broadcast %6 : vector<1x8xf32> to vector<8x8xf32>
    %8 = tpu.concatenate %4, %1, %7 in 0 : vector<8x8xf32>, vector<16x8xf32>, vector<8x8xf32> -> vector<32x8xf32>
    %c2_i32 = arith.constant 2 : i32
    %9 = tpu.dynamic_rotate %8 by %c2_i32 dim 0 : vector<32x8xf32>, i32 -> vector<32x8xf32>
    %c31_i32 = arith.constant 31 : i32
    %10 = tpu.dynamic_rotate %8 by %c31_i32 dim 0 : vector<32x8xf32>, i32 -> vector<32x8xf32>
    %11 = arith.addf %8, %10 : vector<32x8xf32>
    %c30_i32 = arith.constant 30 : i32
    %12 = tpu.dynamic_rotate %11 by %c30_i32 dim 0 : vector<32x8xf32>, i32 -> vector<32x8xf32>
    %13 = arith.addf %11, %12 : vector<32x8xf32>
    %c1_i32 = arith.constant 1 : i32
    %14 = tpu.dynamic_rotate %13 by %c1_i32 dim 0 : vector<32x8xf32>, i32 -> vector<32x8xf32>
    %15 = arith.addf %9, %14 : vector<32x8xf32>
    %16 = vector.extract_strided_slice %15 {offsets = [8, 0], sizes = [16, 8], strides = [1, 1]} : vector<32x8xf32> to vector<16x8xf32>
    %cst = arith.constant 2.000000e-01 : f32
    %17 = vector.broadcast %cst : f32 to vector<16x8xf32>
    %18 = arith.mulf %16, %17 : vector<16x8xf32>
    %c0_2 = arith.constant 0 : index
    %c0_3 = arith.constant 0 : index
    %c0_4 = arith.constant 0 : index
    %19 = vector.load %arg4[%c0_2, %c0_3, %c0_4] : memref<1x16x8xf32, #tpu.memory_space<vmem>>, vector<1x16x8xf32>
    %20 = vector.shape_cast %19 : vector<1x16x8xf32> to vector<16x8xf32>
    %21 = vector.shape_cast %18 : vector<16x8xf32> to vector<1x16x8xf32>
    tpu.vector_store %arg4[%c0_2, %c0_3, %c0_4], %21 {strides = array<i32>} : memref<1x16x8xf32, #tpu.memory_space<vmem>>, vector<1x16x8xf32>,
    %22 = arith.subf %1, %18 : vector<16x8xf32>
    %c0_5 = arith.constant 0 : index
    %c0_6 = arith.constant 0 : index
    %c0_7 = arith.constant 0 : index
    %23 = vector.load %arg3[%c0_5, %c0_6, %c0_7] : memref<1x16x8xf32, #tpu.memory_space<vmem>>, vector<1x16x8xf32>
    %24 = vector.shape_cast %23 : vector<1x16x8xf32> to vector<16x8xf32>
    %25 = vector.shape_cast %22 : vector<16x8xf32> to vector<1x16x8xf32>
    tpu.vector_store %arg3[%c0_5, %c0_6, %c0_7], %25 {strides = array<i32>} : memref<1x16x8xf32, #tpu.memory_space<vmem>>, vector<1x16x8xf32>,
    return
  }
  func.func @transform_0(%arg0: i32, %arg1: i32) -> (i32, i32, i32) {
    %c0_i32 = arith.constant 0 : i32
    %c0_i32_0 = arith.constant 0 : i32
    return %arg0, %c0_i32, %arg1 : i32, i32, i32
  }
  func.func @transform_1(%arg0: i32, %arg1: i32) -> (i32, i32, i32) {
    %c0_i32 = arith.constant 0 : i32
    %c0_i32_0 = arith.constant 0 : i32
    return %arg0, %c0_i32, %arg1 : i32, i32, i32
  }
  func.func @transform_2(%arg0: i32, %arg1: i32) -> (i32, i32, i32) {
    %c0_i32 = arith.constant 0 : i32
    %c0_i32_0 = arith.constant 0 : i32
    return %arg0, %c0_i32, %arg1 : i32, i32, i32
  }
}

</mosaic_0001>

<bundles_post_ra>
// kernel: tpu_custom_call.1
= control target key start
LH: loop header
LB: loop body
LE: loop exit
PB: predicated region body
PF: predicated region fallthrough
CT: control target
= control target key end

     0   :  { %8 = vsyncpa [#allocation3], 0  ;;  %s901_s0 = inlined_call_operand.hbm [shape: f32[2,16,8], index: 0, kind: input, shape index: {}]   ;;  %s902_s1 = inlined_call_operand.hbm [shape: f32[2,16,8], index: 1, kind: output, shape index: {0}]   ;;  %s903_s2 = inlined_call_operand.hbm [shape: f32[2,16,8], index: 2, kind: output, shape index: {1}]  }
   0x1   :  { %10 = vsyncpa [#allocation3 + $0x1], 0 }
   0x2   :  { %11 = vsyncpa [#allocation4], 0 }
   0x3   :  { %13 = vsyncpa [#allocation4 + $0x1], 0 }
   0x4   :  { %14 = vsyncpa [#allocation7], 0 }
   0x5   :  { %16 = vsyncpa [#allocation7 + $0x1], 0  ;;  %s668_s9 = smov 0   ;;  %s670_s10 = smov 0  }
   0x6   :  { %s672_s11 = smov 0   ;;  %s674_s12 = smov 0  }
   0x7   :  { %s676_s13 = smov 0   ;;  %s678_s14 = smov 0  }
   0x8 LB: > { %s407_s15 = sadd.s32 4294967295, %s644_s14   ;;  %s408_s16 = sadd.s32 4294967294, %s644_s14   ;;  %s644_s14 = sphi %s678_s14, %s22_s14   ;;  %s640_s13 = sphi %s676_s13, %s918_s13   ;;  %s636_s12 = sphi %s674_s12, %s917_s12   ;;  %s632_s11 = sphi %s672_s11, %s916_s11   ;;  %s628_s10 = sphi %s670_s10, %s915_s10   ;;  %s624_s9 = sphi %s668_s9, %s914_s9  }
   0x9   : > { %s34_s17 = sadd.s32 1, %s640_s13  ;;  %s43_s18 = sadd.s32 1, %s632_s11 }
   0xa   : > { %p36_p0 = scmp.ge.s32.totalorder %s34_s17, 2  ;;  %p50_p1 = scmp.ne.s32.totalorder %s632_s11, %s628_s10 }
   0xb   : > { %p51_p2 = scmp.eq.s32.totalorder %s644_s14, 0  ;;  %p56_p3 = scmp.ne.s32.totalorder %s628_s10, %s624_s9 }
   0xc   : > { %s920_s17 = smov (%p36_p0, %s34_s17), 0  ;;  %p57_p5 = scmp.eq.s32.totalorder %s407_s15, 0 }
   0xd   : > { %p709_p4 = por %p51_p2, %p50_p1  ;;  %s38_s20 = ssub.s32 %s640_s13, %s920_s17 }
   0xe   : > { %p82_p6 = scmp.eq.s32.totalorder %s407_s15, 1  ;;  %p41_p7 = scmp.eq.s32.totalorder %s38_s20, 0 }
   0xf   : > { %p715_p8 = por %p57_p5, %p56_p3  ;;  %p88_p10 = scmp.eq.s32.totalorder %s408_s16, 1 }
  0x10   : > { %p719_p9 = por %p82_p6, %p50_p1  ;;  %p446_p13 = scmp.lt.s32.totalorder %s644_s14, 2 }
  0x11   : > { %s724_s23 = scalar_select %p41_p7, %s632_s11, %s43_s18  }
  0x12   : > { %s907_s22 = scalar_select %p719_p9, 1, 0 }
  0x13   : > { %p726_p11 = por %p88_p10, %p56_p3  ;;  %s136_s25 = sand.u32 1, %s632_s11  }
  0x14   : > { %s411_s26 = sshll.u32 %s136_s25, 4  ;;  %s426_s27 = sshll.u32 %s640_s13, 8 }
  0x15   : > { %s908_s24 = scalar_select %p726_p11, 1, 0 }
  0x16   : > { %s737_s30 = scalar_lea.hbm %s901_s0, %s426_s27  ;;  %s140_s3 = scalar_lea.vmem [#allocation2], %s411_s26 }
  0x17   : > { %s148_s4 = sshll.u32 %s140_s3, 4  ;;  %p743_p0 = pnand %p446_p13, %p709_p4  ;;  %s739_s4 = int_to_ptr.vmem [resolvable:$true] %s148_s4 }
  0x18   : > { %s748_s6 = scalar_lea.sflag [#allocation3], %s136_s25  ;;  %s500_s7 = scalar_lea.hbm %s737_s30, 256 }
  0x19   : > { %p501_p2 = scmp.ne.s32.totalorder %s737_s30, %s500_s7  ;;  %p502_p3 = pneg %p743_p0 }
  0x1a   : > { %s505_s16 = scalar_lea.hbm %s901_s0, 512  ;;  %p506_p4 = scmp.lt.u32.totalorder %s737_s30, %s901_s0 }
  0x1b   : > { %p503_p5 = pnand %p502_p3, %p501_p2  ;;  %p507_p7 = scmp.lt.u32.totalorder %s505_s16, %s500_s7 }
  0x1c   : > { %p509_p13 = scmp.lt.u32.totalorder %s500_s7, %s737_s30 }
  0x1d   : > { %p504_p6 = pneg %p503_p5  ;;  %p508_p10 = por %p507_p7, %p506_p4 }
  0x1f   : > { %p510_p12 = por %p509_p13, %p508_p10 }
  0x21   : > { %p511_p1 = pnand %p510_p12, %p504_p6 }
  0x23   : > { %514 = shalt.err (!%p511_p1)
}
  0x24   : > { %s515_s20 = scalar_lea.vmem %s739_s4, 256  ;;  %s646_s25 = smov [#allocation2]  }
  0x25   : > { %p516_p2 = scmp.ne.s32.totalorder %s739_s4, %s515_s20  ;;  %s520_s26 = sshll.u32 %s646_s25, 4  ;;  %s521_s26 = int_to_ptr.vmem [resolvable:$false] %s520_s26 }
  0x26   : > { %s522_s27 = scalar_lea.vmem %s521_s26, 512  ;;  %p523_p9 = scmp.lt.s32.totalorder %s739_s4, %s521_s26 }
  0x27   : > { %p518_p5 = pnand %p516_p2, %p502_p3  ;;  %p524_p4 = scmp.lt.s32.totalorder %s522_s27, %s515_s20 }
  0x29   : > { %p519_p11 = pneg %p518_p5  ;;  %p525_p7 = por %p524_p4, %p523_p9 }
  0x2b   : > { %p526_p10 = pnand %p525_p7, %p519_p11 }
  0x2d   : > { %529 = shalt.err (!%p526_p10)
}
  0x2e   : > { %s647_s28 = smov 128   ;;  %s648_s29 = smov 8  }
  0x2f   : > { %438 = dma.hbm_to_vmem [thread:$0]  (!%p743_p0), %s737_s30, 256, %s739_s4, %s748_s6, %s647_s28, %s647_s28, %s648_s29  }
  0x30   : > { %p156_p12 = scmp.lt.s32.totalorder %s644_s14, 3  ;;  %p910_p1 = scmp.ge.s32.totalorder %s644_s14, 1 }
  0x32   : > { %p157_p3 = pnand %p910_p1, %p156_p12 }
  0x33   : > { %s780_s3 = sand.u32 (!%p157_p3), 1, %s628_s10  }
  0x34   : > { %160 = sbr.rel (%p157_p3) target bundleno = 125 (0x7d), region = 24  ;;  %s783_s7 = sshll.u32 (!%p157_p3), %s780_s3, 4 }
  0x35   : > { %s163_s8 = scalar_lea.sflag (!%p157_p3), [#allocation3], %s780_s3  ;;  %s166_s15 = scalar_lea.vmem (!%p157_p3), [#allocation2], %s783_s7 }
  0x3b   : > { %611 = dma.done.wait (%p715_p8), %s163_s8, 256  }
  0x3c   : > { %613 = vsyncadd (%p715_p8), %s163_s8, 4294967040  ;;  %v194_v0 = vlaneseq  ;;  %v192_v4 = vld [vmem:[%s166_s15] sm:$0xff]  ;;  %v791_v5 = vld [vmem:[%s166_s15 + $0x8] sm:$0xff]  ;;  %s191_s21 = scalar_lea.vmem [#allocation6], %s783_s7  ;;  %s427_s4 = sshll.u32 %s636_s12, 8  ;;  %vm244_vm4 = vcmask 64512  }
  0x3d   : > { %v211_v8 = vrot.slane %v192_v4, 1  ;;  %v212_v9 = vrot.slane %v791_v5, 1  ;;  %v203_v24 = vrot.slane %v192_v4, 6  ;;  %v204_v28 = vrot.slane %v791_v5, 6  ;;  %s288_s30 = sshll.u32 %s191_s21, 4  ;;  %s802_s5 = scalar_lea.vmem [#allocation5], %s783_s7  ;;  %s799_s30 = int_to_ptr.vmem [resolvable:$true] %s288_s30 }
  0x3e   : > { %v195_v1 = vshrl.u32 %v194_v0, 7  ;;  %s271_s6 = sshll.u32 %s802_s5, 4  ;;  %s808_s19 = scalar_lea.hbm %s903_s2, %s427_s4  ;;  %s811_s6 = int_to_ptr.vmem [resolvable:$true] %s271_s6 }
  0x3f   : > { %s818_s25 = scalar_lea.hbm %s902_s1, %s427_s4  ;;  %s257_s26 = scalar_lea.sflag [#allocation7], %s780_s3 }
  0x40   : > { %v196_v2 = vsub.s32 0, %v195_v1  ;;  %v200_v3 = vsub.s32 7, %v195_v1  ;;  %vm214_vm0 = vcmp.lt.s32.totalorder %v195_v1, 7  ;;  %vm227_vm1 = vcmp.lt.s32.totalorder %v195_v1, 6  ;;  %s530_s27 = scalar_lea.vmem %s799_s30, 256  ;;  %p911_p9 = scmp.ne.s32.totalorder %s907_s22, 0 }
  0x41   : > { %v216_v12 = vsel %vm214_vm0, %v211_v8, %v212_v9  ;;  %vm207_vm2 = vcmp.lt.s32.totalorder %v195_v1, 2  ;;  %vm237_vm3 = vcmp.lt.s32.totalorder %v195_v1, 1  ;;  %p531_p8 = scmp.ne.s32.totalorder %s799_s30, %s530_s27  ;;  %s649_s28 = smov [#allocation6]  }
  0x42   : > { %v197_v6 = vrot.slane %v192_v4, %v196_v2  ;;  %v201_v7 = vrot.slane %v791_v5, %v200_v3  ;;  %v220_v15 = vadd.f32 %v216_v12, %v192_v4  ;;  %v208_v36 = vsel %vm207_vm2, %v203_v24, %v204_v28  ;;  %s534_s29 = sshll.u32 %s649_s28, 4  ;;  %s535_s29 = int_to_ptr.vmem [resolvable:$false] %s534_s29 }
  0x43   : > { %p532_p11 = pnand %p531_p8, %p911_p9  ;;  %s536_s7 = scalar_lea.vmem %s535_s29, 512 }
  0x44   : > { %v210_v10 = vrot.slane %v197_v6, 1  ;;  %v213_v11 = vrot.slane %v201_v7, 1  ;;  %v224_v19 = vrot.slane %v220_v15, 2  ;;  %v202_v23 = vrot.slane %v197_v6, 6  ;;  %p537_p6 = scmp.lt.s32.totalorder %s799_s30, %s535_s29  ;;  %p538_p13 = scmp.lt.s32.totalorder %s536_s7, %s530_s27 }
  0x45   : > { %p533_p0 = pneg %p532_p11 }
  0x46   : > { %v215_v13 = vsel %vm214_vm0, %v212_v9, %v213_v11  ;;  %v217_v14 = vsel %vm214_vm0, %v210_v10, %v211_v8  ;;  %v218_v18 = vsel %vm214_vm0, %v213_v11, %v210_v10  ;;  %v209_v33 = vsel %vm207_vm2, %v202_v23, %v203_v24  ;;  %p539_p2 = por %p538_p13, %p537_p6 }
  0x47   : > { %v219_v16 = vadd.f32 %v217_v14, %v197_v6  ;;  %v221_v17 = vadd.f32 %v215_v13, %v791_v5  ;;  %v222_v20 = vadd.f32 %v218_v18, %v201_v7 }
  0x48   : > { %p540_p5 = pnand %p539_p2, %p533_p0 }
  0x49   : > { %v223_v21 = vrot.slane %v219_v16, 2  ;;  %v225_v22 = vrot.slane %v221_v17, 2  ;;  %v226_v25 = vrot.slane %v222_v20, 2 }
  0x4b   : > { %v229_v26 = vsel %vm227_vm1, %v224_v19, %v225_v22  ;;  %v230_v27 = vsel %vm227_vm1, %v223_v21, %v224_v19  ;;  %v228_v31 = vsel %vm227_vm1, %v225_v22, %v226_v25 }
  0x4c   : > { %v231_v29 = vadd.f32 %v230_v27, %v219_v16  ;;  %v232_v30 = vadd.f32 %v229_v26, %v220_v15  ;;  %v233_v32 = vadd.f32 %v228_v31, %v221_v17 }
  0x4e   : > { %v234_v34 = vrot.slane %v231_v29, 7  ;;  %v235_v35 = vrot.slane %v232_v30, 7  ;;  %v236_v37 = vrot.slane %v233_v32, 7 }
  0x50   : > { %v239_v38 = vsel %vm237_vm3, %v234_v34, %v235_v35  ;;  %v238_v40 = vsel %vm237_vm3, %v235_v35, %v236_v37 }
  0x51   : > { %v240_v39 = vadd.f32 %v239_v38, %v209_v33  ;;  %v241_v41 = vadd.f32 %v238_v40, %v208_v36 }
  0x53   : > { %v242_v42 = vmul.f32 0.2, %v240_v39  ;;  %v243_v43 = vmul.f32 0.2, %v241_v41 }
  0x55   : > { %245 = vst.msk [vmem:[%s191_s21] sm:$0xff] %vm244_vm4, %v242_v42  ;;  %v247_v44 = vsub.f32 %v192_v4, %v242_v42  ;;  %246 = vst.msk [vmem:[%s191_s21 + $0x8] sm:$0xff] %vm244_vm4, %v243_v43  ;;  %v248_v45 = vsub.f32 %v791_v5, %v243_v43 }
  0x57   : > { %249 = vst.msk [vmem:[%s802_s5] sm:$0xff] %vm244_vm4, %v247_v44 }
  0x58   : > { %543 = shalt.err (!%p540_p5)
}
  0x59   : > { %s544_s8 = scalar_lea.hbm %s808_s19, 256  ;;  %s548_s4 = scalar_lea.hbm %s903_s2, 512 }
  0x5a   : > { %p545_p4 = scmp.ne.s32.totalorder %s808_s19, %s544_s8  ;;  %p549_p12 = scmp.lt.u32.totalorder %s808_s19, %s903_s2 }
  0x5b   : > { %p550_p1 = scmp.lt.u32.totalorder %s548_s4, %s544_s8  ;;  %p552_p8 = scmp.lt.u32.totalorder %s544_s8, %s808_s19 }
  0x5c   : > { %p546_p7 = pnand %p545_p4, %p911_p9 }
  0x5d   : > { %p551_p3 = por %p550_p1, %p549_p12 }
  0x5e   : > { %p547_p10 = pneg %p546_p7 }
  0x5f   : > { %p553_p11 = por %p552_p8, %p551_p3 }
  0x61   : > { %p554_p0 = pnand %p553_p11, %p547_p10 }
  0x63   : > { %557 = shalt.err (!%p554_p0)
}
  0x64   : > { %s650_s12 = smov 128   ;;  %s651_s20 = smov 8   ;;  %250 = vst.msk [vmem:[%s802_s5 + $0x8] sm:$0xff] %vm244_vm4, %v248_v45 }
  0x65   : > { %432 = dma.vmem_to_hbm [thread:$0]  (%p911_p9), %s799_s30, 256, %s808_s19, %s257_s26, %s650_s12, %s650_s12, %s651_s20  }
  0x66   : > { %s252_s27 = scalar_lea.sflag [#allocation4], %s780_s3  ;;  %s558_s28 = scalar_lea.vmem %s811_s6, 256 }
  0x67   : > { %p559_p6 = scmp.ne.s32.totalorder %s811_s6, %s558_s28  ;;  %s652_s29 = smov [#allocation5]  }
  0x68   : > { %s562_s7 = sshll.u32 %s652_s29, 4  ;;  %s563_s7 = int_to_ptr.vmem [resolvable:$false] %s562_s7 }
  0x69   : > { %p560_p13 = pnand %p559_p6, %p911_p9  ;;  %s564_s8 = scalar_lea.vmem %s563_s7, 512 }
  0x6a   : > { %p565_p5 = scmp.lt.s32.totalorder %s811_s6, %s563_s7  ;;  %p566_p4 = scmp.lt.s32.totalorder %s564_s8, %s558_s28 }
  0x6b   : > { %p561_p2 = pneg %p560_p13 }
  0x6c   : > { %p567_p7 = por %p566_p4, %p565_p5 }
  0x6e   : > { %p568_p10 = pnand %p567_p7, %p561_p2 }
  0x70   : > { %571 = shalt.err (!%p568_p10)
}
  0x71   : > { %s572_s30 = scalar_lea.hbm %s818_s25, 256  ;;  %s576_s26 = scalar_lea.hbm %s902_s1, 512 }
  0x72   : > { %p573_p12 = scmp.ne.s32.totalorder %s818_s25, %s572_s30  ;;  %p577_p8 = scmp.lt.u32.totalorder %s818_s25, %s902_s1 }
  0x73   : > { %p578_p11 = scmp.lt.u32.totalorder %s576_s26, %s572_s30  ;;  %p580_p6 = scmp.lt.u32.totalorder %s572_s30, %s818_s25 }
  0x74   : > { %p574_p1 = pnand %p573_p12, %p911_p9 }
  0x75   : > { %p579_p0 = por %p578_p11, %p577_p8 }
  0x76   : > { %p575_p3 = pneg %p574_p1 }
  0x77   : > { %p581_p13 = por %p580_p6, %p579_p0 }
  0x79   : > { %p582_p2 = pnand %p581_p13, %p575_p3 }
  0x7b   : > { %585 = shalt.err (!%p582_p2)
}
  0x7c   : > { %431 = dma.vmem_to_hbm [thread:$0]  (%p911_p9), %s811_s6, 256, %s818_s25, %s252_s27, %s650_s12, %s650_s12, %s651_s20  }
  0x7d PF: > { %s303_s4 = sand.u32 1, %s624_s9   ;;  %p912_p5 = scmp.ne.s32.totalorder %s908_s24, 0 }
  0x7e   : > { %p913_p4 = scmp.ge.s32.totalorder %s644_s14, 2  ;;  %s304_s16 = scalar_lea.sflag [#allocation4], %s303_s4 }
  0x80   : > { %p440_p7 = pnand %p913_p4, %p912_p5 }
  0x82   : > { %615 = dma.done.wait (!%p440_p7), %s304_s16, 256  }
  0x83   : > { %617 = vsyncadd (!%p440_p7), %s304_s16, 4294967040  ;;  %s313_s22 = scalar_lea.sflag [#allocation7], %s303_s4 }
  0x84   : > { %619 = dma.done.wait (!%p440_p7), %s313_s22, 256  }
  0x85   : > { %621 = vsyncadd (!%p440_p7), %s313_s22, 4294967040  ;;  %s22_s14 = sadd.s32 1, %s644_s14   ;;  %s914_s9 = smov %s628_s10 }
  0x86   : > { %p19_p10 = scmp.ge.s32.totalorder %s22_s14, 4   ;;  %s915_s10 = smov %s632_s11 }
  0x87   : > { %s916_s11 = smov %s724_s23  ;;  %s917_s12 = smov %s640_s13 }
  0x88   : > { %s918_s13 = smov %s920_s17  ;;  %21 = sbr.rel (!%p19_p10) target bundleno = 8 (0x8), region = 86 }
  0x8f   :  { %318 = vsyncpa [#allocation3], 1 }
  0x90   :  { %320 = vsyncpa [#allocation3 + $0x1], 1 }
  0x91   :  { %321 = vsyncpa [#allocation4], 1 }
  0x92   :  { %323 = vsyncpa [#allocation4 + $0x1], 1 }
  0x93   :  { %324 = vsyncpa [#allocation7], 1 }
  0x94   :  { %326 = vsyncpa [#allocation7 + $0x1], 1 }

</bundles_post_ra>
